<compile_context>
chip_gen: v7x
topology: tpu7x:2x2x1
jax: 0.10.0
libtpu: 0.0.40
codegen_flags: <defaults>
</compile_context>

<pallas_src>
import functools

import jax
import jax.numpy as jnp
from jax import lax
from jax.experimental import pallas as pl
from jax.experimental.pallas import tpu as pltpu


def _round_up(x, m):
    return (x + m - 1) // m * m


# ----------------- weight folding (plain JAX, weight/shape-only precompute) -----------------
def _upsample_matrix_1d(n):
    """(n, 2n) matrix U with (x @ U) == bilinear 2x upsample of x along that axis
    (align_corners=False, edge-clamped) -- matches nn.Upsample(scale_factor=2,'bilinear')."""
    U = jnp.zeros((n, 2 * n), dtype=jnp.float32)
    i = jnp.arange(n)
    U = U.at[jnp.maximum(i - 1, 0), 2 * i].add(0.25)
    U = U.at[i, 2 * i].add(0.75)
    U = U.at[i, 2 * i + 1].add(0.75)
    U = U.at[jnp.minimum(i + 1, n - 1), 2 * i + 1].add(0.25)
    return U


def _fold_decoder_weights(w1_oihw, w2_oihw, H, W, L1p, L2p):
    """Fold (H-upsample + SAME zero-pad along H + kh taps + channel mix) into lane-
    concatenated matmul operands; the 3 kw taps sit at 128-aligned lane strides.

    With the input laid out as rows = W position, lanes = c*H + h, the kernel computes
      tap_kw = x @ A1_cat[:, kw-block]          (the kh/channel part of conv1)
      h1[v]  = relu( sum_kw tap_kw[v + kw - 1] )  (the kw part: +/-1 row shift)
    and analogously for conv2 with A2_cat (lane order of the result: o*2H + jo)."""
    f32 = jnp.float32
    w1 = w1_oihw.astype(f32)                      # (Cmid, Cin, 3, 3)
    w2 = w2_oihw.astype(f32)                      # (Cout, Cmid, 3, 3)
    Cmid, Cin = w1.shape[0], w1.shape[1]
    Cout = w2.shape[0]
    HH = 2 * H
    K1, L1, L2 = Cin * H, Cmid * HH, Cout * HH

    # conv1: H-direction 2x bilinear upsample folded with the kh taps (zero-padded).
    UH = _upsample_matrix_1d(H).T                               # (HH, H)
    UHpad = jnp.pad(UH, ((1, 1), (0, 0)))                       # (HH+2, H)
    R1 = jnp.stack([UHpad[kh:kh + HH] for kh in range(3)])      # R1[kh, j, h] = UHpad[j+kh, h]
    # A1[kw][(c,h), (m,j)] = sum_kh w1[m,c,kh,kw] * R1[kh,j,h]
    A1 = jnp.einsum('mckw,kjh->wchmj', w1, R1).reshape(3, K1, L1)

    # conv2: identical construction with identity instead of the upsample matrix.
    Ipad = jnp.pad(jnp.eye(HH, dtype=f32), ((1, 1), (0, 0)))    # (HH+2, HH)
    R2 = jnp.stack([Ipad[kh:kh + HH] for kh in range(3)])       # R2[kh, jo, j]
    # A2[kw][(m,j), (o,jo)] = sum_kh w2[o,m,kh,kw] * R2[kh,jo,j]
    A2 = jnp.einsum('omkw,kij->wmjoi', w2, R2).reshape(3, L1, L2)

    # Concatenate the 3 kw taps along the lane axis at 128-aligned strides so the
    # kernel's per-tap lane slices never need a relayout.
    A1_cat = jnp.zeros((K1, 3 * L1p), f32)
    A2_cat = jnp.zeros((L1p, 3 * L2p), f32)
    for kw in range(3):
        A1_cat = A1_cat.at[:, kw * L1p: kw * L1p + L1].set(A1[kw])
        A2_cat = A2_cat.at[:L1, kw * L2p: kw * L2p + L2].set(A2[kw])
    return A1_cat, A2_cat


def _combine_matrix(mb, ww):
    """(mb, 3*mb) 0/1 matrix combining the three kw-tap tiles (stacked along rows in a
    VMEM scratch) into the conv output rows:
        out[v] = sum_kw tap_kw[v + kw - 1],
    with contributions zeroed outside each sample's block of ww rows (SAME zero pad
    along W and no cross-sample leakage when several samples share the M axis)."""
    v = jnp.arange(mb)[:, None]
    u = jnp.arange(mb)[None, :]
    same = (v // ww) == (u // ww)
    taps = [((u == v + kw - 1) & same).astype(jnp.float32) for kw in range(3)]
    return jnp.concatenate(taps, axis=1)


# ------------------------------- fused Pallas kernel -------------------------------
def _decoder_se_block_kernel(x_ref, a1_ref, a2_ref, c_ref, o_ref, stack_ref,
                             *, l1p, l2p, mid_dtype):
    # x_ref    : (MB, Cin*H)        MB = samples_per_step * 2W rows (batch folded into M)
    # a1_ref   : (Cin*H, 3*l1p)     conv1 folded weights, 3 kw taps on the lane axis
    # a2_ref   : (l1p, 3*l2p)       conv2 folded weights, 3 kw taps on the lane axis
    # c_ref    : (MB, 3*MB)         0/1 tap-combine + edge-mask matrix (shared by both stages)
    # o_ref    : (MB, l2p)          lane-dense (128-padded) output block
    # stack_ref: (3*MB, max(l1p,l2p)) f32 VMEM scratch for the sublane-stacked tap tiles
    mb = x_ref.shape[0]
    c = c_ref[...]

    # ---- stage 1: ConvRelu(Cin -> Cmid) on the 2x-upsampled input ----
    t1 = jnp.dot(x_ref[...], a1_ref[...], preferred_element_type=jnp.float32)  # (mb, 3*l1p)
    for kw in range(3):                       # aligned stores: lane offsets %128, rows %8
        stack_ref[kw * mb:(kw + 1) * mb, 0:l1p] = t1[:, kw * l1p:(kw + 1) * l1p]
    h1 = jnp.dot(c, stack_ref[:, 0:l1p], preferred_element_type=jnp.float32)   # kw combine
    h1 = jnp.maximum(h1, 0.0).astype(mid_dtype)                                # ReLU #1

    # ---- stage 2: ConvRelu(Cmid -> Cout) ----
    t2 = jnp.dot(h1, a2_ref[...], preferred_element_type=jnp.float32)          # (mb, 3*l2p)
    for kw in range(3):
        stack_ref[kw * mb:(kw + 1) * mb, 0:l2p] = t2[:, kw * l2p:(kw + 1) * l2p]
    h2 = jnp.dot(c, stack_ref[:, 0:l2p], preferred_element_type=jnp.float32)
    o_ref[...] = jnp.maximum(h2, 0.0).astype(o_ref.dtype)                      # ReLU #2


def decoder_se_block_v2(x_nchw, w1_oihw, w2_oihw, *, samples_per_step=None, use_bf16=True):
    """DecoderSEBlockV2.forward: Upsample(2x,bilinear) -> Conv3x3+ReLU -> Conv3x3+ReLU.

    x: (N, Cin, H, W) NCHW; w1: (Cmid, Cin, 3, 3) OIHW; w2: (Cout, Cmid, 3, 3) OIHW.
    Returns (N, Cout, 2H, 2W) NCHW.
    """
    N, Cin, H, W = x_nchw.shape
    Cmid = w1_oihw.shape[0]
    Cout = w2_oihw.shape[0]
    HH, WW = 2 * H, 2 * W
    K1 = Cin * H
    L1, L2 = Cmid * HH, Cout * HH
    L1p, L2p = _round_up(L1, 128), _round_up(L2, 128)
    Lmax = max(L1p, L2p)

    if samples_per_step is None:
        samples_per_step = N          # one grid step: best for single-TC v5e/v6e
    assert N % samples_per_step == 0
    steps = N // samples_per_step
    MB = samples_per_step * WW        # rows per grid step (multiple of 8 since W%4==0 here)

    A1_cat, A2_cat = _fold_decoder_weights(w1_oihw, w2_oihw, H, W, L1p, L2p)
    C = _combine_matrix(MB, WW)

    # W-direction bilinear upsample + transpose to the lane-dense layout
    # (rows = W position per sample, lanes = c*H + h).  Cheap linear XLA plumbing;
    # the H-upsample and both 3x3 convs stay fused inside the kernel.
    UW = _upsample_matrix_1d(W)                                   # (W, 2W)
    xt = jnp.transpose(x_nchw.astype(jnp.float32), (0, 3, 1, 2)).reshape(N, W, K1)
    xu = jnp.einsum('wv,nwk->nvk', UW, xt).reshape(N * WW, K1)

    cdt = jnp.bfloat16 if use_bf16 else jnp.float32               # MXU-native operands
    xu, A1_cat, A2_cat = xu.astype(cdt), A1_cat.astype(cdt), A2_cat.astype(cdt)

    kernel = functools.partial(_decoder_se_block_kernel, l1p=L1p, l2p=L2p, mid_dtype=cdt)

    out_t = pl.pallas_call(
        kernel,
        out_shape=jax.ShapeDtypeStruct((N * WW, L2p), jnp.float32),
        grid=(steps,),
        in_specs=[
            pl.BlockSpec((MB, K1), lambda i: (i, 0)),
            # Constant-index folded weights (loaded once; single grid step by default).
            pl.BlockSpec((K1, 3 * L1p), lambda i: (0, 0)),
            pl.BlockSpec((L1p, 3 * L2p), lambda i: (0, 0)),
            pl.BlockSpec((MB, 3 * MB), lambda i: (0, 0)),
        ],
        out_specs=pl.BlockSpec((MB, L2p), lambda i: (i, 0)),
        scratch_shapes=[pltpu.VMEM((3 * MB, Lmax), jnp.float32)],
        compiler_params=pltpu.CompilerParams(
            dimension_semantics=("parallel",),
            vmem_limit_bytes=32 * 1024 * 1024),
    )(xu, A1_cat, A2_cat, C)

    # (N*2W, L2p) -> crop the 128-pad lanes -> (N, Cout, 2H, 2W): cheap XLA layout plumbing.
    out = out_t.reshape(N, WW, L2p)[:, :, :L2].reshape(N, WW, Cout, HH)
    return jnp.transpose(out, (0, 2, 3, 1))


# ------------------------------- pure-JAX reference -------------------------------
def _upsample2x_bilinear_ref(x, axis):
    n = x.shape[axis]
    prev = jnp.concatenate([lax.slice_in_dim(x, 0, 1, axis=axis),
                            lax.slice_in_dim(x, 0, n - 1, axis=axis)], axis=axis)
    nxt = jnp.concatenate([lax.slice_in_dim(x, 1, n, axis=axis),
                           lax.slice_in_dim(x, n - 1, n, axis=axis)], axis=axis)
    even = 0.25 * prev + 0.75 * x
    odd = 0.75 * x + 0.25 * nxt
    stacked = jnp.stack([even, odd], axis=axis + 1)
    new_shape = list(x.shape)
    new_shape[axis] = 2 * n
    return stacked.reshape(new_shape)


def _decoder_ref(x, w1, w2):
    x = _upsample2x_bilinear_ref(x, 2)
    x = _upsample2x_bilinear_ref(x, 3)
    y = lax.conv_general_dilated(x, w1, (1, 1), "SAME",
                                 dimension_numbers=("NCHW", "OIHW", "NCHW"))
    y = jnp.maximum(y, 0.0)
    y = lax.conv_general_dilated(y, w2, (1, 1), "SAME",
                                 dimension_numbers=("NCHW", "OIHW", "NCHW"))
    return jnp.maximum(y, 0.0)


if __name__ == "__main__":
    # DecoderSEBlockV2(in_channels=4, middle_channels=8, out_channels=4) at small scale.
    in_ch, mid_ch, out_ch = 4, 8, 4
    N, H, W = 2, 8, 8

    key = jax.random.PRNGKey(0)
    kx, k1, k2 = jax.random.split(key, 3)
    x = jax.random.normal(kx, (N, in_ch, H, W), dtype=jnp.float32)                   # NCHW
    w1 = jax.random.normal(k1, (mid_ch, in_ch, 3, 3), dtype=jnp.float32) * 0.1       # OIHW
    w2 = jax.random.normal(k2, (out_ch, mid_ch, 3, 3), dtype=jnp.float32) * 0.1      # OIHW

    ref = jax.block_until_ready(_decoder_ref(x, w1, w2))

    # f32 operand path: checks the folding / layout exactly.
    fwd_f32 = jax.jit(functools.partial(decoder_se_block_v2, use_bf16=False))
    out_f32 = jax.block_until_ready(fwd_f32(x, w1, w2))
    assert out_f32.shape == (N, out_ch, 2 * H, 2 * W), out_f32.shape
    err_f32 = float(jnp.max(jnp.abs(out_f32 - ref)))
    assert jnp.allclose(out_f32, ref, atol=1e-3, rtol=1e-3), err_f32

    # bf16 operand path (default): tolerance sized for bf16 operand rounding over the
    # folded contractions (errors ~sqrt(K)*2^-9); real semantic bugs would be O(1).
    fwd_bf16 = jax.jit(decoder_se_block_v2)
    out_bf16 = jax.block_until_ready(fwd_bf16(x, w1, w2))
    assert out_bf16.shape == (N, out_ch, 2 * H, 2 * W), out_bf16.shape
    err_bf16 = float(jnp.max(jnp.abs(out_bf16 - ref)))
    assert jnp.allclose(out_bf16, ref, atol=5e-2, rtol=5e-2), err_bf16

    print("KERNEL_OK")
</pallas_src>

<mosaic_0001>
module attributes {stable_mosaic.version = 11 : i64} {
  func.func @_decoder_se_block_kernel(%arg0: i32, %arg1: memref<32x32xf32, #tpu.memory_space<vmem>>, %arg2: memref<32x384xf32, #tpu.memory_space<vmem>>, %arg3: memref<128x384xf32, #tpu.memory_space<vmem>>, %arg4: memref<32x96xf32, #tpu.memory_space<vmem>>, %arg5: memref<32x128xf32, #tpu.memory_space<vmem>>, %arg6: memref<96x128xf32, #tpu.memory_space<vmem>>) attributes {dimension_semantics = [#tpu.dimension_semantics<parallel>], iteration_bounds = array<i64: 1>, scalar_prefetch = 0 : i64, scratch_operands = 1 : i64, tpu.core_type = #tpu.core_type<tc>, window_params = [{transform_indices = @transform_0, window_bounds = array<i64: 32, 32>}, {pipeline_mode = #tpu.pipeline_mode<synchronous>, transform_indices = @transform_1, window_bounds = array<i64: 32, 384>}, {pipeline_mode = #tpu.pipeline_mode<synchronous>, transform_indices = @transform_2, window_bounds = array<i64: 128, 384>}, {pipeline_mode = #tpu.pipeline_mode<synchronous>, transform_indices = @transform_3, window_bounds = array<i64: 32, 96>}, {transform_indices = @transform_4, window_bounds = array<i64: 32, 128>}]} {
    %c0 = arith.constant 0 : index
    %c0_0 = arith.constant 0 : index
    %0 = vector.load %arg4[%c0, %c0_0] : memref<32x96xf32, #tpu.memory_space<vmem>>, vector<32x96xf32>
    %c0_1 = arith.constant 0 : index
    %c0_2 = arith.constant 0 : index
    %1 = vector.load %arg1[%c0_1, %c0_2] : memref<32x32xf32, #tpu.memory_space<vmem>>, vector<32x32xf32>
    %c0_3 = arith.constant 0 : index
    %c0_4 = arith.constant 0 : index
    %2 = vector.load %arg2[%c0_3, %c0_4] : memref<32x384xf32, #tpu.memory_space<vmem>>, vector<32x384xf32>
    %cst = arith.constant dense<0.000000e+00> : vector<32x384xf32>
    %3 = tpu.matmul %1, %2, %cst {dimension_numbers = #tpu.dot_dimension_numbers<[1], [0], [0], [1], [0, 0, 1, 1], [], []>} : vector<32x32xf32>, vector<32x384xf32>, vector<32x384xf32> -> vector<32x384xf32>
    %4 = vector.extract_strided_slice %3 {offsets = [0, 0], sizes = [32, 128], strides = [1, 1]} : vector<32x384xf32> to vector<32x128xf32>
    %c0_5 = arith.constant 0 : index
    %c0_6 = arith.constant 0 : index
    %5 = vector.load %arg6[%c0_5, %c0_6] : memref<96x128xf32, #tpu.memory_space<vmem>>, vector<32x128xf32>
    tpu.vector_store %arg6[%c0_5, %c0_6], %4 {strides = array<i32>} : memref<96x128xf32, #tpu.memory_space<vmem>>, vector<32x128xf32>,
    %6 = vector.extract_strided_slice %3 {offsets = [0, 128], sizes = [32, 128], strides = [1, 1]} : vector<32x384xf32> to vector<32x128xf32>
    %c32 = arith.constant 32 : index
    %c0_7 = arith.constant 0 : index
    %7 = vector.load %arg6[%c32, %c0_7] : memref<96x128xf32, #tpu.memory_space<vmem>>, vector<32x128xf32>
    tpu.vector_store %arg6[%c32, %c0_7], %6 {strides = array<i32>} : memref<96x128xf32, #tpu.memory_space<vmem>>, vector<32x128xf32>,
    %8 = vector.extract_strided_slice %3 {offsets = [0, 256], sizes = [32, 128], strides = [1, 1]} : vector<32x384xf32> to vector<32x128xf32>
    %c64 = arith.constant 64 : index
    %c0_8 = arith.constant 0 : index
    %9 = vector.load %arg6[%c64, %c0_8] : memref<96x128xf32, #tpu.memory_space<vmem>>, vector<32x128xf32>
    tpu.vector_store %arg6[%c64, %c0_8], %8 {strides = array<i32>} : memref<96x128xf32, #tpu.memory_space<vmem>>, vector<32x128xf32>,
    %c0_9 = arith.constant 0 : index
    %c0_10 = arith.constant 0 : index
    %10 = vector.load %arg6[%c0_9, %c0_10] : memref<96x128xf32, #tpu.memory_space<vmem>>, vector<96x128xf32>
    %cst_11 = arith.constant dense<0.000000e+00> : vector<32x128xf32>
    %11 = tpu.matmul %0, %10, %cst_11 {dimension_numbers = #tpu.dot_dimension_numbers<[1], [0], [0], [1], [0, 0, 1, 1], [], []>} : vector<32x96xf32>, vector<96x128xf32>, vector<32x128xf32> -> vector<32x128xf32>
    %cst_12 = arith.constant 0.000000e+00 : f32
    %12 = vector.broadcast %cst_12 : f32 to vector<32x128xf32>
    %13 = arith.maximumf %11, %12 : vector<32x128xf32>
    %c0_13 = arith.constant 0 : index
    %c0_14 = arith.constant 0 : index
    %14 = vector.load %arg3[%c0_13, %c0_14] : memref<128x384xf32, #tpu.memory_space<vmem>>, vector<128x384xf32>
    %cst_15 = arith.constant dense<0.000000e+00> : vector<32x384xf32>
    %15 = tpu.matmul %13, %14, %cst_15 {dimension_numbers = #tpu.dot_dimension_numbers<[1], [0], [0], [1], [0, 0, 1, 1], [], []>} : vector<32x128xf32>, vector<128x384xf32>, vector<32x384xf32> -> vector<32x384xf32>
    %16 = vector.extract_strided_slice %15 {offsets = [0, 0], sizes = [32, 128], strides = [1, 1]} : vector<32x384xf32> to vector<32x128xf32>
    %c0_16 = arith.constant 0 : index
    %c0_17 = arith.constant 0 : index
    %17 = vector.load %arg6[%c0_16, %c0_17] : memref<96x128xf32, #tpu.memory_space<vmem>>, vector<32x128xf32>
    tpu.vector_store %arg6[%c0_16, %c0_17], %16 {strides = array<i32>} : memref<96x128xf32, #tpu.memory_space<vmem>>, vector<32x128xf32>,
    %18 = vector.extract_strided_slice %15 {offsets = [0, 128], sizes = [32, 128], strides = [1, 1]} : vector<32x384xf32> to vector<32x128xf32>
    %c32_18 = arith.constant 32 : index
    %c0_19 = arith.constant 0 : index
    %19 = vector.load %arg6[%c32_18, %c0_19] : memref<96x128xf32, #tpu.memory_space<vmem>>, vector<32x128xf32>
    tpu.vector_store %arg6[%c32_18, %c0_19], %18 {strides = array<i32>} : memref<96x128xf32, #tpu.memory_space<vmem>>, vector<32x128xf32>,
    %20 = vector.extract_strided_slice %15 {offsets = [0, 256], sizes = [32, 128], strides = [1, 1]} : vector<32x384xf32> to vector<32x128xf32>
    %c64_20 = arith.constant 64 : index
    %c0_21 = arith.constant 0 : index
    %21 = vector.load %arg6[%c64_20, %c0_21] : memref<96x128xf32, #tpu.memory_space<vmem>>, vector<32x128xf32>
    tpu.vector_store %arg6[%c64_20, %c0_21], %20 {strides = array<i32>} : memref<96x128xf32, #tpu.memory_space<vmem>>, vector<32x128xf32>,
    %c0_22 = arith.constant 0 : index
    %c0_23 = arith.constant 0 : index
    %22 = vector.load %arg6[%c0_22, %c0_23] : memref<96x128xf32, #tpu.memory_space<vmem>>, vector<96x128xf32>
    %cst_24 = arith.constant dense<0.000000e+00> : vector<32x128xf32>
    %23 = tpu.matmul %0, %22, %cst_24 {dimension_numbers = #tpu.dot_dimension_numbers<[1], [0], [0], [1], [0, 0, 1, 1], [], []>} : vector<32x96xf32>, vector<96x128xf32>, vector<32x128xf32> -> vector<32x128xf32>
    %cst_25 = arith.constant 0.000000e+00 : f32
    %24 = vector.broadcast %cst_25 : f32 to vector<32x128xf32>
    %25 = arith.maximumf %23, %24 : vector<32x128xf32>
    %c0_26 = arith.constant 0 : index
    %c0_27 = arith.constant 0 : index
    %26 = vector.load %arg5[%c0_26, %c0_27] : memref<32x128xf32, #tpu.memory_space<vmem>>, vector<32x128xf32>
    tpu.vector_store %arg5[%c0_26, %c0_27], %25 {strides = array<i32>} : memref<32x128xf32, #tpu.memory_space<vmem>>, vector<32x128xf32>,
    return
  }
  func.func @transform_0(%arg0: i32) -> (i32, i32) {
    %c0_i32 = arith.constant 0 : i32
    %c0_i32_0 = arith.constant 0 : i32
    return %arg0, %c0_i32 : i32, i32
  }
  func.func @transform_1(%arg0: i32) -> (i32, i32) {
    %c0_i32 = arith.constant 0 : i32
    %c0_i32_0 = arith.constant 0 : i32
    %c0_i32_1 = arith.constant 0 : i32
    return %c0_i32, %c0_i32_0 : i32, i32
  }
  func.func @transform_2(%arg0: i32) -> (i32, i32) {
    %c0_i32 = arith.constant 0 : i32
    %c0_i32_0 = arith.constant 0 : i32
    %c0_i32_1 = arith.constant 0 : i32
    return %c0_i32, %c0_i32_0 : i32, i32
  }
  func.func @transform_3(%arg0: i32) -> (i32, i32) {
    %c0_i32 = arith.constant 0 : i32
    %c0_i32_0 = arith.constant 0 : i32
    %c0_i32_1 = arith.constant 0 : i32
    return %c0_i32, %c0_i32_0 : i32, i32
  }
  func.func @transform_4(%arg0: i32) -> (i32, i32) {
    %c0_i32 = arith.constant 0 : i32
    %c0_i32_0 = arith.constant 0 : i32
    return %arg0, %c0_i32 : i32, i32
  }
}

</mosaic_0001>

<bundles_post_ra>
// kernel: decoder_se_block_v2.1
= control target key start
LH: loop header
LB: loop body
LE: loop exit
PB: predicated region body
PF: predicated region fallthrough
CT: control target
= control target key end

     0   :  { %v1010_v3 = vmov 0.0   ;;  %vm37_vm0 = vcmask 261120   ;;  %vm248_vm1 = vcmask 785408   ;;  %s1292_s1 = inlined_call_operand.vmem [shape: f32[32,384], index: 1, kind: input, shape index: {}]   ;;  %s1293_s0 = inlined_call_operand.vmem [shape: f32[32,32], index: 0, kind: input, shape index: {}]   ;;  %s1294_s3 = inlined_call_operand.vmem [shape: f32[32,96], index: 3, kind: input, shape index: {}]   ;;  %s1295_s2 = inlined_call_operand.vmem [shape: f32[128,384], index: 2, kind: input, shape index: {}]   ;;  %s1296_s4 = inlined_call_operand.vmem [shape: f32[32,128], index: 4, kind: output, shape index: {}]  }
   0x1   :  { %v26_v0 = vld [vmem:[%s1292_s1 + $0x8] sm:$0xff]  ;;  %v29_v1 = vld [vmem:[%s1292_s1 + $0x20] sm:$0xff]  ;;  %114 = vmatprep.mubr.f32.mxu0 %v1010_v3  ;;  %v28_v5 = vld [vmem:[%s1292_s1 + $0x18] sm:$0xff] }
   0x2   :  { %v25_v2 = vld [vmem:[%s1292_s1] sm:$0xff]  ;;  %v881_v4 = vpack.c.bf16 %v29_v1, %v26_v0  ;;  %v32_v6 = vld [vmem:[%s1292_s1 + $0x38] sm:$0xff]  ;;  %v35_v7 = vld [vmem:[%s1292_s1 + $0x50] sm:$0xff] }
   0x3   :  { %v883_v8 = vpack.c.bf16 %v28_v5, %v25_v2  ;;  %v885_v9 = vpack.c.bf16 %v35_v7, %v32_v6  ;;  %v31_v10 = vld [vmem:[%s1292_s1 + $0x30] sm:$0xff]  ;;  %v34_v11 = vld [vmem:[%s1292_s1 + $0x48] sm:$0xff]  ;;  %v21_v12 = vld [vmem:[%s1293_s0] sm:$0xff] }
   0x4   :  { %882 = vmatprep.subr.bf16.mxu0 %v881_v4  ;;  %777 = vmatprep.mubr.msk.f32.mxu1 %vm37_vm0, %v21_v12  ;;  %v887_v13 = vpack.c.bf16 %v34_v11, %v31_v10  ;;  %v27_v14 = vld [vmem:[%s1292_s1 + $0x10] sm:$0xff]  ;;  %v30_v15 = vld [vmem:[%s1292_s1 + $0x28] sm:$0xff]  ;;  %v33_v16 = vld [vmem:[%s1292_s1 + $0x40] sm:$0xff] }
   0x5   :  { %884 = vmatpush1.bf16.msra.mxu0 %v883_v8  ;;  %v889_v17 = vpack.c.bf16 %v30_v15, %v27_v14  ;;  %v36_v18 = vld [vmem:[%s1292_s1 + $0x58] sm:$0xff]  ;;  %v22_v20 = vld [vmem:[%s1293_s0 + $0x8] sm:$0xff]  ;;  %v23_v21 = vld [vmem:[%s1293_s0 + $0x10] sm:$0xff] }
   0x6   :  { %886 = vmatprep.subr.bf16.mxu0 %v885_v9  ;;  %v893_v19 = vpack.c.bf16 %v36_v18, %v33_v16  ;;  %v24_v22 = vld [vmem:[%s1293_s0 + $0x18] sm:$0xff]  ;;  %v1100_v23 = vld [vmem:[%s1294_s3] sm:$0xff]  ;;  %v351_v24 = vld [vmem:[%s1295_s2 + $0x8] sm:$0xff] }
   0x7   :  { %890 = vmatprep.subr.bf16.mxu1 %v889_v17  ;;  %v354_v25 = vld [vmem:[%s1295_s2 + $0x20] sm:$0xff]  ;;  %v353_v28 = vld [vmem:[%s1295_s2 + $0x18] sm:$0xff]  ;;  %v360_v31 = vld [vmem:[%s1295_s2 + $0x50] sm:$0xff] }
   0x8   :  { %892 = vmatpush3.bf16.msra.mxu1 %v889_v17  ;;  %v350_v26 = vld [vmem:[%s1295_s2] sm:$0xff]  ;;  %v921_v27 = vpack.c.bf16 %v354_v25, %v351_v24  ;;  %v357_v30 = vld [vmem:[%s1295_s2 + $0x38] sm:$0xff]  ;;  %v356_v32 = vld [vmem:[%s1295_s2 + $0x30] sm:$0xff] }
   0x9   :  { %888 = vmatpush1.bf16.msra.mxu0 %v887_v13  ;;  %894 = vmatprep.subr.bf16.mxu1 %v893_v19  ;;  %v923_v29 = vpack.c.bf16 %v353_v28, %v350_v26  ;;  %v925_v33 = vpack.c.bf16 %v360_v31, %v357_v30  ;;  %v359_v34 = vld [vmem:[%s1295_s2 + $0x48] sm:$0xff]  ;;  %v366_v37 = vld [vmem:[%s1295_s2 + $0x80] sm:$0xff]  ;;  %v365_v40 = vld [vmem:[%s1295_s2 + $0x78] sm:$0xff] }
   0xa   :  { %v927_v35 = vpack.c.bf16 %v359_v34, %v356_v32  ;;  %v363_v36 = vld [vmem:[%s1295_s2 + $0x68] sm:$0xff]  ;;  %v362_v39 = vld [vmem:[%s1295_s2 + $0x60] sm:$0xff]  ;;  %v369_v41 = vld [vmem:[%s1295_s2 + $0x98] sm:$0xff] }
   0xb   :  { %v929_v38 = vpack.c.bf16 %v366_v37, %v363_v36  ;;  %v372_v42 = vld [vmem:[%s1295_s2 + $0xb0] sm:$0xff]  ;;  %v931_v43 = vpack.c.bf16 %v365_v40, %v362_v39  ;;  %v371_v46 = vld [vmem:[%s1295_s2 + $0xa8] sm:$0xff]  ;;  %v378_v48 = vld [vmem:[%s1295_s2 + $0xe0] sm:$0xff] }
   0xc   :  { %693 = vmatmul.mubr.msk.f32.vlgmr.msra.gmra.mrb[0].mxu0 %vm37_vm0, %v21_v12  ;;  %896 = vmatpush3.bf16.msra.mxu1 %v893_v19  ;;  %v933_v44 = vpack.c.bf16 %v372_v42, %v369_v41  ;;  %v368_v45 = vld [vmem:[%s1295_s2 + $0x90] sm:$0xff]  ;;  %v375_v47 = vld [vmem:[%s1295_s2 + $0xc8] sm:$0xff]  ;;  %v374_v51 = vld [vmem:[%s1295_s2 + $0xc0] sm:$0xff] }
   0xd   :  { %120 = vmatprep.mubr.f32.mxu0 %v1010_v3  ;;  %922 = vmatprep.subr.bf16.mxu1 %v921_v27  ;;  %v935_v49 = vpack.c.bf16 %v371_v46, %v368_v45  ;;  %v937_v50 = vpack.c.bf16 %v378_v48, %v375_v47  ;;  %v377_v52 = vld [vmem:[%s1295_s2 + $0xd8] sm:$0xff]  ;;  %v384_v54 = vld [vmem:[%s1295_s2 + $0x110] sm:$0xff]  ;;  %v383_v58 = vld [vmem:[%s1295_s2 + $0x108] sm:$0xff] }
   0xe   :  { %v381_v53 = vld [vmem:[%s1295_s2 + $0xf8] sm:$0xff]  ;;  %v939_v55 = vpack.c.bf16 %v377_v52, %v374_v51  ;;  %v380_v57 = vld [vmem:[%s1295_s2 + $0xf0] sm:$0xff]  ;;  %v387_v59 = vld [vmem:[%s1295_s2 + $0x128] sm:$0xff] }
   0xf   :  { %778 = vmatmul.mubr.msk.f32.vlgmr.msra.gmra.mrb[0].mxu1 %vm37_vm0, %v22_v20  ;;  %v941_v56 = vpack.c.bf16 %v384_v54, %v381_v53  ;;  %v390_v60 = vld [vmem:[%s1295_s2 + $0x140] sm:$0xff]  ;;  %v943_v61 = vpack.c.bf16 %v383_v58, %v380_v57  ;;  %v389_v0 = vld [vmem:[%s1295_s2 + $0x138] sm:$0xff]  ;;  %v1203_v27 = vld [vmem:[%s1294_s3 + $0x8] sm:$0xff] }
  0x10   :  { %694 = vmatmul.mubr.msk.f32.gmra.mrb[2].mxu0 %vm37_vm0, %v22_v20  ;;  %780 = vmatprep.mubr.msk.f32.mxu1 %vm37_vm0, %v23_v21  ;;  %v945_v62 = vpack.c.bf16 %v390_v60, %v387_v59  ;;  %v386_v63 = vld [vmem:[%s1295_s2 + $0x120] sm:$0xff]  ;;  %v361_v26 = vld [vmem:[%s1295_s2 + $0x58] sm:$0xff]  ;;  %v1208_v28 = vld [vmem:[%s1294_s3 + $0x10] sm:$0xff] }
  0x11   :  { %126 = vmatprep.mubr.f32.mxu0 %v1010_v3  ;;  %924 = vmatpush1.bf16.msra.mxu1 %v923_v29  ;;  %v947_v1 = vpack.c.bf16 %v389_v0, %v386_v63  ;;  %v358_v25 = vld [vmem:[%s1295_s2 + $0x40] sm:$0xff]  ;;  %v364_v30 = vld [vmem:[%s1295_s2 + $0x70] sm:$0xff]  ;;  %v367_v31 = vld [vmem:[%s1295_s2 + $0x88] sm:$0xff] }
  0x12   :  { %926 = vmatprep.subr.bf16.mxu1 %v925_v33  ;;  %v957_v29 = vpack.c.bf16 %v361_v26, %v358_v25  ;;  %v1223_v32 = vld [vmem:[%s1294_s3 + $0x18] sm:$0xff]  ;;  %v961_v33 = vpack.c.bf16 %v367_v31, %v364_v30  ;;  %v370_v34 = vld [vmem:[%s1295_s2 + $0xa0] sm:$0xff]  ;;  %v376_v37 = vld [vmem:[%s1295_s2 + $0xd0] sm:$0xff] }
  0x13   :  { %781 = vmatmul.mubr.msk.f32.gmra.mrb[2].mxu1 %vm37_vm0, %v24_v22  ;;  %v382_v40 = vld [vmem:[%s1295_s2 + $0x100] sm:$0xff]  ;;  %v385_v41 = vld [vmem:[%s1295_s2 + $0x118] sm:$0xff]  ;;  %v396_v47 = vld [vmem:[%s1295_s2 + $0x170] sm:$0xff] }
  0x14   :  { %695 = vmatmul.mubr.msk.f32.gmra.mrb[4].mxu0 %vm37_vm0, %v23_v21  ;;  %462 = vmatprep.mubr.f32.mxu1 %v1010_v3  ;;  %v352_v21 = vld [vmem:[%s1295_s2 + $0x10] sm:$0xff]  ;;  %v973_v42 = vpack.c.bf16 %v385_v41, %v382_v40  ;;  %v393_v46 = vld [vmem:[%s1295_s2 + $0x158] sm:$0xff]  ;;  %v394_v51 = vld [vmem:[%s1295_s2 + $0x160] sm:$0xff] }
  0x15   :  { %132 = vmatprep.mubr.f32.mxu0 %v1010_v3  ;;  %928 = vmatpush1.bf16.msra.mxu1 %v927_v35  ;;  %v373_v35 = vld [vmem:[%s1295_s2 + $0xb8] sm:$0xff]  ;;  %v949_v48 = vpack.c.bf16 %v396_v47, %v393_v46 }
  0x16   :  { %930 = vmatprep.subr.bf16.mxu1 %v929_v38  ;;  %v965_v36 = vpack.c.bf16 %v373_v35, %v370_v34  ;;  %v379_v38 = vld [vmem:[%s1295_s2 + $0xe8] sm:$0xff]  ;;  %v397_v53 = vld [vmem:[%s1295_s2 + $0x178] sm:$0xff] }
  0x17   :  { %v969_v39 = vpack.c.bf16 %v379_v38, %v376_v37  ;;  %v981_v54 = vpack.c.bf16 %v397_v53, %v394_v51 }
  0x18   :  { %696 = vmatmul.mubr.msk.f32.gmra.mrb[6].mxu0 %vm37_vm0, %v24_v22  ;;  %v355_v22 = vld [vmem:[%s1295_s2 + $0x28] sm:$0xff] }
  0x19   :  { %807 = vmatprep.mubr.msk.f32.mxu0 %vm248_vm1, %v1100_v23  ;;  %932 = vmatpush1.bf16.msra.mxu1 %v931_v43  ;;  %v953_v24 = vpack.c.bf16 %v355_v22, %v352_v21  ;;  %v388_v43 = vld [vmem:[%s1295_s2 + $0x130] sm:$0xff] }
  0x1a   :  { %934 = vmatprep.subr.bf16.mxu1 %v933_v44  ;;  %v391_v44 = vld [vmem:[%s1295_s2 + $0x148] sm:$0xff] }
  0x1b   :  { %v977_v45 = vpack.c.bf16 %v391_v44, %v388_v43 }
  0x1d   :  { %936 = vmatpush1.bf16.msra.mxu1 %v935_v49  ;;  %v392_v49 = vld [vmem:[%s1295_s2 + $0x150] sm:$0xff] }
  0x1e   :  { %938 = vmatprep.subr.bf16.mxu1 %v937_v50  ;;  %v395_v50 = vld [vmem:[%s1295_s2 + $0x168] sm:$0xff] }
  0x1f   :  { %v951_v52 = vpack.c.bf16 %v395_v50, %v392_v49 }
  0x21   :  { %940 = vmatpush1.bf16.msra.mxu1 %v939_v55 }
  0x22   :  { %942 = vmatprep.subr.bf16.mxu1 %v941_v56 }
  0x25   :  { %944 = vmatpush1.bf16.msra.mxu1 %v943_v61 }
  0x26   :  { %946 = vmatprep.subr.bf16.mxu1 %v945_v62 }
  0x29   :  { %948 = vmatpush1.bf16.msra.mxu1 %v947_v1 }
  0x2a   :  { %950 = vmatprep.subr.bf16.mxu1 %v949_v48 }
  0x2d   :  { %952 = vmatpush1.bf16.msra.mxu1 %v951_v52 }
  0xdf   :  { %v116_v2 = vpop.f32.mrb[0].mxu0 }
  0xe0   :  { %v118_v4 = vpop.f32.mrb[1].mxu0 }
  0xe2   :  { %v779_v6 = vpop.f32.mrb[0].mxu1 }
  0xe3   :  { %v122_v5 = vpop.f32.mrb[2].mxu0  ;;  %v205_v9 = vpop.f32.mrb[1].mxu1 }
  0xe4   :  { %v897_v7 = vpack.c.bf16 %v122_v5, %v116_v2  ;;  %v124_v8 = vpop.f32.mrb[3].mxu0  ;;  %v913_v11 = vpack.c.bf16 %v779_v6, %v205_v9 }
  0xe5   :  { %v905_v10 = vpack.c.bf16 %v124_v8, %v118_v4 }
  0xe6   :  { %898 = vmatprep.subr.bf16.mxu0 %v897_v7  ;;  %v782_v13 = vpop.f32.mrb[2].mxu1 }
  0xe7   :  { %v128_v12 = vpop.f32.mrb[4].mxu0  ;;  %900 = vmatpush3.bf16.msra.mxu0 %v897_v7  ;;  %v215_v15 = vpop.f32.mrb[3].mxu1 }
  0xe8   :  { %v130_v14 = vpop.f32.mrb[5].mxu0  ;;  %v917_v16 = vpack.c.bf16 %v782_v13, %v215_v15 }
  0xeb   :  { %v134_v17 = vpop.f32.mrb[6].mxu0 }
  0xec   :  { %v901_v18 = vpack.c.bf16 %v134_v17, %v128_v12  ;;  %v136_v19 = vpop.f32.mrb[7].mxu0 }
  0xed   :  { %v909_v20 = vpack.c.bf16 %v136_v19, %v130_v14 }
  0xee   :  { %902 = vmatprep.subr.bf16.mxu0 %v901_v18 }
  0xef   :  { %904 = vmatpush3.bf16.msra.mxu0 %v901_v18 }
  0xf0   :  { %906 = vmatprep.subr.bf16.mxu0 %v905_v10 }
  0xf3   :  { %908 = vmatpush3.bf16.msra.mxu0 %v905_v10 }
  0xf4   :  { %910 = vmatprep.subr.bf16.mxu0 %v909_v20 }
  0xf7   :  { %912 = vmatpush3.bf16.msra.mxu0 %v909_v20 }
  0xf8   :  { %914 = vmatprep.subr.bf16.mxu0 %v913_v11 }
  0xfb   :  { %916 = vmatpush3.bf16.msra.mxu0 %v913_v11 }
  0xfc   :  { %918 = vmatprep.subr.bf16.mxu0 %v917_v16 }
  0xff   :  { %920 = vmatpush3.bf16.msra.mxu0 %v917_v16 }
 0x100   :  { %954 = vmatprep.subr.bf16.mxu0 %v953_v24 }
 0x102   :  { %808 = vmatmul.mubr.msk.f32.vlgmr.msra.gmra.mrb[8].mxu0 %vm248_vm1, %v1203_v27 }
 0x103   :  { %810 = vmatprep.mubr.msk.f32.mxu0 %vm248_vm1, %v1208_v28  ;;  %956 = vmatpush3.bf16.msra.mxu0 %v953_v24 }
 0x104   :  { %958 = vmatprep.subr.bf16.mxu0 %v957_v29 }
 0x106   :  { %811 = vmatmul.mubr.msk.f32.gmra.mrb[10].mxu0 %vm248_vm1, %v1223_v32 }
 0x107   :  { %960 = vmatpush3.bf16.msra.mxu0 %v957_v29 }
 0x108   :  { %962 = vmatprep.subr.bf16.mxu0 %v961_v33 }
 0x10b   :  { %964 = vmatpush3.bf16.msra.mxu0 %v961_v33 }
 0x10c   :  { %966 = vmatprep.subr.bf16.mxu0 %v965_v36 }
 0x10f   :  { %968 = vmatpush3.bf16.msra.mxu0 %v965_v36 }
 0x110   :  { %970 = vmatprep.subr.bf16.mxu0 %v969_v39 }
 0x113   :  { %972 = vmatpush3.bf16.msra.mxu0 %v969_v39 }
 0x114   :  { %974 = vmatprep.subr.bf16.mxu0 %v973_v42 }
 0x117   :  { %976 = vmatpush3.bf16.msra.mxu0 %v973_v42 }
 0x118   :  { %978 = vmatprep.subr.bf16.mxu0 %v977_v45 }
 0x11b   :  { %980 = vmatpush3.bf16.msra.mxu0 %v977_v45 }
 0x11c   :  { %982 = vmatprep.subr.bf16.mxu0 %v981_v54 }
 0x11f   :  { %984 = vmatpush3.bf16.msra.mxu0 %v981_v54 }
 0x1d5   :  { %v809_v55 = vpop.f32.mrb[8].mxu0 }
 0x1d6   :  { %v327_v56 = vpop.f32.mrb[9].mxu0  ;;  %v347_v58 = vmax.f32 %v809_v55, 0.0 }
 0x1d7   :  { %v346_v57 = vmax.f32 %v327_v56, 0.0 }
 0x1d9   :  { %463 = vmatmul.mubr.f32.vlgmr.msra.gmra.mrb[4].mxu1 %v346_v57  ;;  %845 = vmatprep.mubr.f32.mxu0 %v346_v57  ;;  %v812_v59 = vpop.f32.mrb[10].mxu0 }
 0x1da   :  { %v349_v60 = vmax.f32 %v812_v59, 0.0  ;;  %846 = vmatmul.mubr.f32.vlgmr.msra.gmra.mrb[12].mxu0 %v347_v58  ;;  %v337_v61 = vpop.f32.mrb[11].mxu0  ;;  %468 = vmatprep.mubr.f32.mxu1 %v1010_v3 }
 0x1db   :  { %v348_v62 = vmax.f32 %v337_v61, 0.0 }
 0x1dd   :  { %469 = vmatmul.mubr.f32.gmra.mrb[6].mxu1 %v347_v58  ;;  %848 = vmatprep.mubr.f32.mxu0 %v348_v62 }
 0x1de   :  { %849 = vmatmul.mubr.f32.gmra.mrb[14].mxu0 %v349_v60  ;;  %474 = vmatprep.mubr.f32.mxu1 %v1010_v3 }
 0x1e1   :  { %475 = vmatmul.mubr.f32.gmra.mrb[8].mxu1 %v348_v62 }
 0x1e2   :  { %480 = vmatprep.mubr.f32.mxu1 %v1010_v3 }
 0x1e5   :  { %481 = vmatmul.mubr.f32.gmra.mrb[10].mxu1 %v349_v60 }
 0x1e6   :  { %875 = vmatprep.mubr.msk.f32.mxu1 %vm248_vm1, %v1100_v23 }
 0x2ac   :  { %v464_v63 = vpop.f32.mrb[4].mxu1 }
 0x2ad   :  { %v466_v0 = vpop.f32.mrb[5].mxu1  ;;  %v847_v1 = vpop.f32.mrb[12].mxu0 }
 0x2ae   :  { %v553_v2 = vpop.f32.mrb[13].mxu0 }
 0x2af   :  { %v1001_v4 = vpack.c.bf16 %v847_v1, %v553_v2 }
 0x2b0   :  { %v470_v5 = vpop.f32.mrb[6].mxu1 }
 0x2b1   :  { %v985_v6 = vpack.c.bf16 %v470_v5, %v464_v63  ;;  %v472_v7 = vpop.f32.mrb[7].mxu1  ;;  %v850_v8 = vpop.f32.mrb[14].mxu0 }
 0x2b2   :  { %v993_v9 = vpack.c.bf16 %v472_v7, %v466_v0  ;;  %v563_v10 = vpop.f32.mrb[15].mxu0 }
 0x2b3   :  { %v1005_v11 = vpack.c.bf16 %v850_v8, %v563_v10  ;;  %986 = vmatprep.subr.bf16.mxu1 %v985_v6 }
 0x2b4   :  { %v476_v12 = vpop.f32.mrb[8].mxu1  ;;  %988 = vmatpush3.bf16.msra.mxu1 %v985_v6 }
 0x2b5   :  { %v478_v3 = vpop.f32.mrb[9].mxu1 }
 0x2b8   :  { %v482_v13 = vpop.f32.mrb[10].mxu1 }
 0x2b9   :  { %v989_v14 = vpack.c.bf16 %v482_v13, %v476_v12  ;;  %v484_v15 = vpop.f32.mrb[11].mxu1 }
 0x2ba   :  { %v997_v23 = vpack.c.bf16 %v484_v15, %v478_v3 }
 0x2bb   :  { %990 = vmatprep.subr.bf16.mxu1 %v989_v14 }
 0x2bc   :  { %992 = vmatpush3.bf16.msra.mxu1 %v989_v14 }
 0x2bd   :  { %994 = vmatprep.subr.bf16.mxu1 %v993_v9 }
 0x2c0   :  { %996 = vmatpush3.bf16.msra.mxu1 %v993_v9 }
 0x2c1   :  { %998 = vmatprep.subr.bf16.mxu1 %v997_v23 }
 0x2c4   :  { %1000 = vmatpush3.bf16.msra.mxu1 %v997_v23 }
 0x2c5   :  { %1002 = vmatprep.subr.bf16.mxu1 %v1001_v4 }
 0x2c8   :  { %1004 = vmatpush3.bf16.msra.mxu1 %v1001_v4 }
 0x2c9   :  { %1006 = vmatprep.subr.bf16.mxu1 %v1005_v11 }
 0x2cc   :  { %1008 = vmatpush3.bf16.msra.mxu1 %v1005_v11 }
 0x2cf   :  { %876 = vmatmul.mubr.msk.f32.vlgmr.msra.gmra.mrb[12].mxu1 %vm248_vm1, %v1203_v27 }
 0x2d0   :  { %878 = vmatprep.mubr.msk.f32.mxu1 %vm248_vm1, %v1208_v28 }
 0x2d3   :  { %879 = vmatmul.mubr.msk.f32.gmra.mrb[14].mxu1 %vm248_vm1, %v1223_v32 }
 0x3a2   :  { %v877_v16 = vpop.f32.mrb[12].mxu1 }
 0x3a3   :  { %v682_v17 = vmax.f32 %v877_v16, 0.0  ;;  %v662_v18 = vpop.f32.mrb[13].mxu1 }
 0x3a4   :  { %v681_v19 = vmax.f32 %v662_v18, 0.0 }
 0x3a5   :  { %686 = vst [vmem:[%s1296_s4 + $0x8] sm:$0xff] %v682_v17 }
 0x3a6   :  { %685 = vst [vmem:[%s1296_s4] sm:$0xff] %v681_v19  ;;  %v880_v20 = vpop.f32.mrb[14].mxu1 }
 0x3a7   :  { %v684_v21 = vmax.f32 %v880_v20, 0.0  ;;  %v672_v22 = vpop.f32.mrb[15].mxu1 }
 0x3a8   :  { %v683_v24 = vmax.f32 %v672_v22, 0.0 }
 0x3a9   :  { %688 = vst [vmem:[%s1296_s4 + $0x18] sm:$0xff] %v684_v21 }
 0x3aa   :  { %687 = vst [vmem:[%s1296_s4 + $0x10] sm:$0xff] %v683_v24 }

</bundles_post_ra>
